<compile_context>
chip_gen: v7x
topology: tpu7x:2x2x1
jax: 0.10.0
libtpu: 0.0.40
codegen_flags: <defaults>
</compile_context>

<pallas_src>
import numpy as np
import jax
import jax.numpy as jnp
from jax import lax
from jax.experimental import pallas as pl
from jax.experimental.pallas import tpu as pltpu

STD_MIN = 0.1
STD_MAX = 10.0

# dot_general dims contracting the LAST dim of both operands (A @ B^T):
# lhs = W^T (out_feat, in_feat), rhs = activations (tile_b, in_feat).
_NT_DIMS = (((1,), (1,)), ((), ()))


def _softplus(x):
    # One-exp numerically-stable softplus (single EUP exp + log1p, no select).
    return jnp.maximum(x, 0.0) + jnp.log1p(jnp.exp(-jnp.abs(x)))


def model_prior_kernel(z_ref, a_ref,
                       w1zT_ref, w1aT_ref, b1_ref,
                       w2T_ref, b2_ref,
                       w3T_ref, b3_ref,
                       meanT_ref, stdT_ref):
    # Layer 1 (fused concat, batch on lanes):
    #   h^T = W1z^T @ z^T + W1a^T @ a^T + b1      -> (H, tile_b)
    hT = (lax.dot_general(w1zT_ref[...], z_ref[...], _NT_DIMS,
                          preferred_element_type=jnp.float32)
          + lax.dot_general(w1aT_ref[...], a_ref[...], _NT_DIMS,
                            preferred_element_type=jnp.float32)
          + b1_ref[...])
    hT = jnp.maximum(hT, 0.0)

    # Layer 2: W2^T @ h^T + b2, ReLU.  Matmul operands in the weight dtype
    # (bf16 fast path on v6e/v7x); accumulation stays f32.
    cdt = w2T_ref.dtype
    hT = (jnp.dot(w2T_ref[...], hT.astype(cdt),
                  preferred_element_type=jnp.float32) + b2_ref[...])
    hT = jnp.maximum(hT, 0.0)

    # Fused output head: one (2L, H) @ (H, tile_b) matmul; the mean/std split
    # is a cheap sublane slice in this layout (L is a multiple of 8).
    yT = (jnp.dot(w3T_ref[...], hT.astype(cdt),
                  preferred_element_type=jnp.float32) + b3_ref[...])
    L = meanT_ref.shape[0]
    meanT = yT[:L, :]
    stdT = yT[L:, :]

    meanT = 30.0 * jnp.tanh(meanT * (1.0 / 30.0))
    stdT = STD_MAX - _softplus(STD_MAX - stdT)
    stdT = STD_MIN + _softplus(stdT - STD_MIN)

    meanT_ref[...] = meanT.astype(meanT_ref.dtype)
    stdT_ref[...] = stdT.astype(stdT_ref.dtype)


def _round_up(x, m):
    return ((x + m - 1) // m) * m


def _cdiv(a, b):
    return -(-a // b)


def _pick_tile_b(batch, requested):
    """Lane-dense batch tile: multiple of 128; >= 2 grid steps when batch > 128."""
    if batch <= 128:
        return batch                                   # single full-extent tile
    req = _round_up(max(int(requested), 128), 128)     # lane-dense, (8,128)-legal
    cap = _round_up(_cdiv(batch, 2), 128)              # >= 2 tiles -> both v7x TCs busy
    return min(req, cap)


def _block_vmem_bytes(shape, dtype):
    # (8,128)-tiled VMEM footprint of one 2-D block.
    sub = _round_up(shape[-2], 8)
    lane = _round_up(shape[-1], 128)
    return sub * lane * np.dtype(dtype).itemsize


def model_prior_forward_t(z, action, params, *, tile_b=1024,
                          compute_dtype=jnp.float32):
    """ModelPrior forward. Returns (mean^T, std^T), each of shape (latent, batch).

    The feature-major layout is the kernel's native lane-dense output layout;
    use model_prior_forward() for row-major (batch, latent) results (costs one
    extra transpose pass over the outputs).
    """
    w1, b1, w2, b2, w3, b3 = params
    batch, latent_dims = z.shape
    action_dims = action.shape[-1]
    hidden_dims = w1.shape[-1]

    assert w1.shape[0] == latent_dims + action_dims, "W1 fan_in mismatch"
    assert w3.shape[1] == 2 * latent_dims, "W3 fan_out must equal 2*latent_dims"
    assert b3.shape[-1] == 2 * latent_dims, "b3 must equal 2*latent_dims"

    # Weight-only host-side prep (tiny): split W1 by input (fused concat),
    # transpose to the feature-major layout, biases become column vectors so
    # they broadcast over the lane (batch) axis.  Matmul operands are cast to
    # compute_dtype (bf16 halves DMA bytes + vreg footprint on v6e/v7x).
    w1zT = jnp.asarray(w1[:latent_dims, :].T, compute_dtype)          # (H, L)
    w1aT = jnp.asarray(w1[latent_dims:, :].T, compute_dtype)          # (H, A)
    w2T = jnp.asarray(w2.T, compute_dtype)                            # (H, H)
    w3T = jnp.asarray(w3.T, compute_dtype)                            # (2L, H)
    b1c = jnp.asarray(b1, jnp.float32).reshape(hidden_dims, 1)        # (H, 1)
    b2c = jnp.asarray(b2, jnp.float32).reshape(hidden_dims, 1)        # (H, 1)
    b3c = jnp.asarray(b3, jnp.float32).reshape(2 * latent_dims, 1)    # (2L, 1)
    z = z.astype(compute_dtype)
    action = action.astype(compute_dtype)

    tile_b = _pick_tile_b(batch, tile_b)
    n_tiles = _cdiv(batch, tile_b)   # ragged last tile handled by Pallas masking

    def batch_rows(i):   # activations: (tile_b, feat) blocks of row-major inputs
        return (i, 0)

    def batch_cols(i):   # outputs: (feat, tile_b) lane-dense blocks
        return (0, i)

    def resident(i):     # weights/biases pinned at block (0, 0) -> VMEM-resident
        return (0, 0)

    in_blocks = [
        ((tile_b, latent_dims), batch_rows, compute_dtype),           # z
        ((tile_b, action_dims), batch_rows, compute_dtype),           # action
        ((hidden_dims, latent_dims), resident, compute_dtype),        # W1z^T
        ((hidden_dims, action_dims), resident, compute_dtype),        # W1a^T
        ((hidden_dims, 1), resident, jnp.float32),                    # b1
        ((hidden_dims, hidden_dims), resident, compute_dtype),        # W2^T
        ((hidden_dims, 1), resident, jnp.float32),                    # b2
        ((2 * latent_dims, hidden_dims), resident, compute_dtype),    # W3^T
        ((2 * latent_dims, 1), resident, jnp.float32),                # b3
    ]
    out_blocks = [
        ((latent_dims, tile_b), batch_cols, jnp.float32),             # mean^T
        ((latent_dims, tile_b), batch_cols, jnp.float32),             # std^T
    ]

    in_specs = [pl.BlockSpec(shape, imap) for shape, imap, _ in in_blocks]
    out_specs = tuple(pl.BlockSpec(shape, imap) for shape, imap, _ in out_blocks)
    out_shapes = (
        jax.ShapeDtypeStruct((latent_dims, batch), jnp.float32),
        jax.ShapeDtypeStruct((latent_dims, batch), jnp.float32),
    )

    # Scoped-VMEM budget: every block (weights included) is double-buffered by
    # the pipeline; pad each block to its (8,128) VMEM tiling.  Clamp to 48 MiB
    # so the same spec stays inside v7x's 64 MiB physical VMEM.
    vmem_bytes = 2 * sum(_block_vmem_bytes(s, d) for s, _, d in in_blocks + out_blocks)
    vmem_limit = int(min(48 * 1024 * 1024, max(8 * 1024 * 1024, vmem_bytes + 4 * 1024 * 1024)))

    meanT, stdT = pl.pallas_call(
        model_prior_kernel,
        out_shape=out_shapes,
        grid=(n_tiles,),
        in_specs=in_specs,
        out_specs=out_specs,
        compiler_params=pltpu.CompilerParams(
            dimension_semantics=("parallel",),   # batch grid -> shard over v7x's 2 TCs
            vmem_limit_bytes=vmem_limit,
        ),
    )(z, action, w1zT, w1aT, b1c, w2T, b2c, w3T, b3c)
    return meanT, stdT


def model_prior_forward(z, action, params, *, tile_b=1024,
                        compute_dtype=jnp.float32):
    """Row-major convenience wrapper: returns (mean, std) of shape (batch, latent)."""
    meanT, stdT = model_prior_forward_t(z, action, params, tile_b=tile_b,
                                        compute_dtype=compute_dtype)
    return meanT.T, stdT.T


def init_params(key, latent_dims, action_dims, hidden_dims):
    """Deterministic synthetic init (shapes match the torch module)."""
    d_in = latent_dims + action_dims
    d_out = 2 * latent_dims
    k1, k2, k3 = jax.random.split(key, 3)

    def lin(k, fan_in, fan_out):
        scale = 1.0 / np.sqrt(fan_in)
        w = jax.random.uniform(k, (fan_in, fan_out), jnp.float32, -scale, scale)
        b = jnp.zeros((1, fan_out), jnp.float32)
        return w, b

    w1, b1 = lin(k1, d_in, hidden_dims)
    w2, b2 = lin(k2, hidden_dims, hidden_dims)
    w3, b3 = lin(k3, hidden_dims, d_out)
    return (w1, b1, w2, b2, w3, b3)


def _reference(z, action, params):
    w1, b1, w2, b2, w3, b3 = params
    x = jnp.concatenate([z, action], axis=-1)
    h = jax.nn.relu(x @ w1 + b1)
    h = jax.nn.relu(h @ w2 + b2)
    y = h @ w3 + b3
    L = z.shape[-1]
    mean, std = y[:, :L], y[:, L:]
    mean = 30.0 * jnp.tanh(mean / 30.0)
    std = STD_MAX - jax.nn.softplus(STD_MAX - std)
    std = STD_MIN + jax.nn.softplus(std - STD_MIN)
    return mean, std


if __name__ == "__main__":
    latent_dims = 16
    action_dims = 8
    hidden_dims = 32

    key = jax.random.PRNGKey(0)
    kz, ka, kp, kz2, ka2 = jax.random.split(key, 5)
    params = init_params(kp, latent_dims, action_dims, hidden_dims)

    # Case 1: tiny batch -> single full-extent tile; row-major convenience API.
    batch = 8
    z = jax.random.normal(kz, (batch, latent_dims), jnp.float32)
    action = jax.random.normal(ka, (batch, action_dims), jnp.float32)
    mean, std = model_prior_forward(z, action, params)
    jax.block_until_ready((mean, std))
    ref_mean, ref_std = _reference(z, action, params)
    np.testing.assert_allclose(np.asarray(mean), np.asarray(ref_mean),
                               rtol=1e-5, atol=1e-5)
    np.testing.assert_allclose(np.asarray(std), np.asarray(ref_std),
                               rtol=1e-5, atol=1e-5)

    # Case 2: multi-tile ragged batch (two lane-dense 128-wide tiles, second
    # partial) using the kernel's native transposed outputs; no host pad/slice.
    batch2 = 200
    z2 = jax.random.normal(kz2, (batch2, latent_dims), jnp.float32)
    action2 = jax.random.normal(ka2, (batch2, action_dims), jnp.float32)
    meanT2, stdT2 = model_prior_forward_t(z2, action2, params, tile_b=128)
    jax.block_until_ready((meanT2, stdT2))
    ref_mean2, ref_std2 = _reference(z2, action2, params)
    np.testing.assert_allclose(np.asarray(meanT2.T), np.asarray(ref_mean2),
                               rtol=1e-5, atol=1e-5)
    np.testing.assert_allclose(np.asarray(stdT2.T), np.asarray(ref_std2),
                               rtol=1e-5, atol=1e-5)

    # Case 3: bf16 matmul operands (v6e/v7x MXU fast path); f32 accumulation,
    # loose tolerance vs the f32 reference.
    meanT_bf, stdT_bf = model_prior_forward_t(z2, action2, params, tile_b=128,
                                              compute_dtype=jnp.bfloat16)
    jax.block_until_ready((meanT_bf, stdT_bf))
    np.testing.assert_allclose(np.asarray(meanT_bf.T), np.asarray(ref_mean2),
                               rtol=5e-2, atol=5e-2)
    np.testing.assert_allclose(np.asarray(stdT_bf.T), np.asarray(ref_std2),
                               rtol=5e-2, atol=5e-2)

    print("KERNEL_OK")
</pallas_src>

<mosaic_0001>
module attributes {stable_mosaic.version = 11 : i64} {
  func.func @model_prior_kernel(%arg0: i32, %arg1: memref<8x16xf32, #tpu.memory_space<vmem>>, %arg2: memref<8x8xf32, #tpu.memory_space<vmem>>, %arg3: memref<32x16xf32, #tpu.memory_space<vmem>>, %arg4: memref<32x8xf32, #tpu.memory_space<vmem>>, %arg5: memref<32x1xf32, #tpu.memory_space<vmem>>, %arg6: memref<32x32xf32, #tpu.memory_space<vmem>>, %arg7: memref<32x1xf32, #tpu.memory_space<vmem>>, %arg8: memref<32x32xf32, #tpu.memory_space<vmem>>, %arg9: memref<32x1xf32, #tpu.memory_space<vmem>>, %arg10: memref<16x8xf32, #tpu.memory_space<vmem>>, %arg11: memref<16x8xf32, #tpu.memory_space<vmem>>) attributes {dimension_semantics = [#tpu.dimension_semantics<parallel>], iteration_bounds = array<i64: 1>, scalar_prefetch = 0 : i64, scratch_operands = 0 : i64, tpu.core_type = #tpu.core_type<tc>, window_params = [{transform_indices = @transform_0, window_bounds = array<i64: 8, 16>}, {transform_indices = @transform_1, window_bounds = array<i64: 8, 8>}, {pipeline_mode = #tpu.pipeline_mode<synchronous>, transform_indices = @transform_2, window_bounds = array<i64: 32, 16>}, {pipeline_mode = #tpu.pipeline_mode<synchronous>, transform_indices = @transform_3, window_bounds = array<i64: 32, 8>}, {pipeline_mode = #tpu.pipeline_mode<synchronous>, transform_indices = @transform_4, window_bounds = array<i64: 32, 1>}, {pipeline_mode = #tpu.pipeline_mode<synchronous>, transform_indices = @transform_5, window_bounds = array<i64: 32, 32>}, {pipeline_mode = #tpu.pipeline_mode<synchronous>, transform_indices = @transform_6, window_bounds = array<i64: 32, 1>}, {pipeline_mode = #tpu.pipeline_mode<synchronous>, transform_indices = @transform_7, window_bounds = array<i64: 32, 32>}, {pipeline_mode = #tpu.pipeline_mode<synchronous>, transform_indices = @transform_8, window_bounds = array<i64: 32, 1>}, {transform_indices = @transform_9, window_bounds = array<i64: 16, 8>}, {transform_indices = @transform_10, window_bounds = array<i64: 16, 8>}]} {
    %c0 = arith.constant 0 : index
    %c0_0 = arith.constant 0 : index
    %0 = vector.load %arg3[%c0, %c0_0] : memref<32x16xf32, #tpu.memory_space<vmem>>, vector<32x16xf32>
    %c0_1 = arith.constant 0 : index
    %c0_2 = arith.constant 0 : index
    %1 = vector.load %arg1[%c0_1, %c0_2] : memref<8x16xf32, #tpu.memory_space<vmem>>, vector<8x16xf32>
    %cst = arith.constant dense<0.000000e+00> : vector<32x8xf32>
    %2 = tpu.matmul %0, %1, %cst {dimension_numbers = #tpu.dot_dimension_numbers<[1], [1], [0], [0], [0, 0, 1, 0], [], []>} : vector<32x16xf32>, vector<8x16xf32>, vector<32x8xf32> -> vector<32x8xf32>
    %c0_3 = arith.constant 0 : index
    %c0_4 = arith.constant 0 : index
    %3 = vector.load %arg4[%c0_3, %c0_4] : memref<32x8xf32, #tpu.memory_space<vmem>>, vector<32x8xf32>
    %c0_5 = arith.constant 0 : index
    %c0_6 = arith.constant 0 : index
    %4 = vector.load %arg2[%c0_5, %c0_6] : memref<8x8xf32, #tpu.memory_space<vmem>>, vector<8x8xf32>
    %cst_7 = arith.constant dense<0.000000e+00> : vector<32x8xf32>
    %5 = tpu.matmul %3, %4, %cst_7 {dimension_numbers = #tpu.dot_dimension_numbers<[1], [1], [0], [0], [0, 0, 1, 0], [], []>} : vector<32x8xf32>, vector<8x8xf32>, vector<32x8xf32> -> vector<32x8xf32>
    %6 = arith.addf %2, %5 : vector<32x8xf32>
    %c0_8 = arith.constant 0 : index
    %c0_9 = arith.constant 0 : index
    %7 = vector.load %arg5[%c0_8, %c0_9] : memref<32x1xf32, #tpu.memory_space<vmem>>, vector<32x1xf32>
    %8 = vector.broadcast %7 : vector<32x1xf32> to vector<32x8xf32>
    %9 = arith.addf %6, %8 : vector<32x8xf32>
    %cst_10 = arith.constant 0.000000e+00 : f32
    %10 = vector.broadcast %cst_10 : f32 to vector<32x8xf32>
    %11 = arith.maximumf %9, %10 : vector<32x8xf32>
    %c0_11 = arith.constant 0 : index
    %c0_12 = arith.constant 0 : index
    %12 = vector.load %arg6[%c0_11, %c0_12] : memref<32x32xf32, #tpu.memory_space<vmem>>, vector<32x32xf32>
    %cst_13 = arith.constant dense<0.000000e+00> : vector<32x8xf32>
    %13 = tpu.matmul %12, %11, %cst_13 {dimension_numbers = #tpu.dot_dimension_numbers<[1], [0], [0], [1], [0, 0, 1, 1], [], []>} : vector<32x32xf32>, vector<32x8xf32>, vector<32x8xf32> -> vector<32x8xf32>
    %c0_14 = arith.constant 0 : index
    %c0_15 = arith.constant 0 : index
    %14 = vector.load %arg7[%c0_14, %c0_15] : memref<32x1xf32, #tpu.memory_space<vmem>>, vector<32x1xf32>
    %15 = vector.broadcast %14 : vector<32x1xf32> to vector<32x8xf32>
    %16 = arith.addf %13, %15 : vector<32x8xf32>
    %cst_16 = arith.constant 0.000000e+00 : f32
    %17 = vector.broadcast %cst_16 : f32 to vector<32x8xf32>
    %18 = arith.maximumf %16, %17 : vector<32x8xf32>
    %c0_17 = arith.constant 0 : index
    %c0_18 = arith.constant 0 : index
    %19 = vector.load %arg8[%c0_17, %c0_18] : memref<32x32xf32, #tpu.memory_space<vmem>>, vector<32x32xf32>
    %cst_19 = arith.constant dense<0.000000e+00> : vector<32x8xf32>
    %20 = tpu.matmul %19, %18, %cst_19 {dimension_numbers = #tpu.dot_dimension_numbers<[1], [0], [0], [1], [0, 0, 1, 1], [], []>} : vector<32x32xf32>, vector<32x8xf32>, vector<32x8xf32> -> vector<32x8xf32>
    %c0_20 = arith.constant 0 : index
    %c0_21 = arith.constant 0 : index
    %21 = vector.load %arg9[%c0_20, %c0_21] : memref<32x1xf32, #tpu.memory_space<vmem>>, vector<32x1xf32>
    %22 = vector.broadcast %21 : vector<32x1xf32> to vector<32x8xf32>
    %23 = arith.addf %20, %22 : vector<32x8xf32>
    %24 = vector.extract_strided_slice %23 {offsets = [0, 0], sizes = [16, 8], strides = [1, 1]} : vector<32x8xf32> to vector<16x8xf32>
    %25 = vector.extract_strided_slice %23 {offsets = [16, 0], sizes = [16, 8], strides = [1, 1]} : vector<32x8xf32> to vector<16x8xf32>
    %cst_22 = arith.constant 0.0333333351 : f32
    %26 = vector.broadcast %cst_22 : f32 to vector<16x8xf32>
    %27 = arith.mulf %24, %26 : vector<16x8xf32>
    %28 = math.tanh %27 : vector<16x8xf32>
    %cst_23 = arith.constant 3.000000e+01 : f32
    %29 = vector.broadcast %cst_23 : f32 to vector<16x8xf32>
    %30 = arith.mulf %29, %28 : vector<16x8xf32>
    %cst_24 = arith.constant 1.000000e+01 : f32
    %31 = vector.broadcast %cst_24 : f32 to vector<16x8xf32>
    %32 = arith.subf %31, %25 : vector<16x8xf32>
    %cst_25 = arith.constant 0.000000e+00 : f32
    %33 = vector.broadcast %cst_25 : f32 to vector<16x8xf32>
    %34 = arith.maximumf %32, %33 : vector<16x8xf32>
    %35 = math.absf %32 : vector<16x8xf32>
    %cst_26 = arith.constant 0.000000e+00 : f32
    %36 = vector.broadcast %cst_26 : f32 to vector<16x8xf32>
    %37 = arith.subf %36, %35 : vector<16x8xf32>
    %38 = math.exp %37 : vector<16x8xf32>
    %39 = math.log1p %38 : vector<16x8xf32>
    %40 = arith.addf %34, %39 : vector<16x8xf32>
    %cst_27 = arith.constant 1.000000e+01 : f32
    %41 = vector.broadcast %cst_27 : f32 to vector<16x8xf32>
    %42 = arith.subf %41, %40 : vector<16x8xf32>
    %cst_28 = arith.constant 1.000000e-01 : f32
    %43 = vector.broadcast %cst_28 : f32 to vector<16x8xf32>
    %44 = arith.subf %42, %43 : vector<16x8xf32>
    %cst_29 = arith.constant 0.000000e+00 : f32
    %45 = vector.broadcast %cst_29 : f32 to vector<16x8xf32>
    %46 = arith.maximumf %44, %45 : vector<16x8xf32>
    %47 = math.absf %44 : vector<16x8xf32>
    %cst_30 = arith.constant 0.000000e+00 : f32
    %48 = vector.broadcast %cst_30 : f32 to vector<16x8xf32>
    %49 = arith.subf %48, %47 : vector<16x8xf32>
    %50 = math.exp %49 : vector<16x8xf32>
    %51 = math.log1p %50 : vector<16x8xf32>
    %52 = arith.addf %46, %51 : vector<16x8xf32>
    %cst_31 = arith.constant 1.000000e-01 : f32
    %53 = vector.broadcast %cst_31 : f32 to vector<16x8xf32>
    %54 = arith.addf %53, %52 : vector<16x8xf32>
    %c0_32 = arith.constant 0 : index
    %c0_33 = arith.constant 0 : index
    %55 = vector.load %arg10[%c0_32, %c0_33] : memref<16x8xf32, #tpu.memory_space<vmem>>, vector<16x8xf32>
    tpu.vector_store %arg10[%c0_32, %c0_33], %30 {strides = array<i32>} : memref<16x8xf32, #tpu.memory_space<vmem>>, vector<16x8xf32>,
    %c0_34 = arith.constant 0 : index
    %c0_35 = arith.constant 0 : index
    %56 = vector.load %arg11[%c0_34, %c0_35] : memref<16x8xf32, #tpu.memory_space<vmem>>, vector<16x8xf32>
    tpu.vector_store %arg11[%c0_34, %c0_35], %54 {strides = array<i32>} : memref<16x8xf32, #tpu.memory_space<vmem>>, vector<16x8xf32>,
    return
  }
  func.func @transform_0(%arg0: i32) -> (i32, i32) {
    %c0_i32 = arith.constant 0 : i32
    %c0_i32_0 = arith.constant 0 : i32
    return %arg0, %c0_i32 : i32, i32
  }
  func.func @transform_1(%arg0: i32) -> (i32, i32) {
    %c0_i32 = arith.constant 0 : i32
    %c0_i32_0 = arith.constant 0 : i32
    return %arg0, %c0_i32 : i32, i32
  }
  func.func @transform_2(%arg0: i32) -> (i32, i32) {
    %c0_i32 = arith.constant 0 : i32
    %c0_i32_0 = arith.constant 0 : i32
    %c0_i32_1 = arith.constant 0 : i32
    return %c0_i32, %c0_i32_0 : i32, i32
  }
  func.func @transform_3(%arg0: i32) -> (i32, i32) {
    %c0_i32 = arith.constant 0 : i32
    %c0_i32_0 = arith.constant 0 : i32
    %c0_i32_1 = arith.constant 0 : i32
    return %c0_i32, %c0_i32_0 : i32, i32
  }
  func.func @transform_4(%arg0: i32) -> (i32, i32) {
    %c0_i32 = arith.constant 0 : i32
    %c0_i32_0 = arith.constant 0 : i32
    %c0_i32_1 = arith.constant 0 : i32
    return %c0_i32, %c0_i32_0 : i32, i32
  }
  func.func @transform_5(%arg0: i32) -> (i32, i32) {
    %c0_i32 = arith.constant 0 : i32
    %c0_i32_0 = arith.constant 0 : i32
    %c0_i32_1 = arith.constant 0 : i32
    return %c0_i32, %c0_i32_0 : i32, i32
  }
  func.func @transform_6(%arg0: i32) -> (i32, i32) {
    %c0_i32 = arith.constant 0 : i32
    %c0_i32_0 = arith.constant 0 : i32
    %c0_i32_1 = arith.constant 0 : i32
    return %c0_i32, %c0_i32_0 : i32, i32
  }
  func.func @transform_7(%arg0: i32) -> (i32, i32) {
    %c0_i32 = arith.constant 0 : i32
    %c0_i32_0 = arith.constant 0 : i32
    %c0_i32_1 = arith.constant 0 : i32
    return %c0_i32, %c0_i32_0 : i32, i32
  }
  func.func @transform_8(%arg0: i32) -> (i32, i32) {
    %c0_i32 = arith.constant 0 : i32
    %c0_i32_0 = arith.constant 0 : i32
    %c0_i32_1 = arith.constant 0 : i32
    return %c0_i32, %c0_i32_0 : i32, i32
  }
  func.func @transform_9(%arg0: i32) -> (i32, i32) {
    %c0_i32 = arith.constant 0 : i32
    %c0_i32_0 = arith.constant 0 : i32
    return %c0_i32, %arg0 : i32, i32
  }
  func.func @transform_10(%arg0: i32) -> (i32, i32) {
    %c0_i32 = arith.constant 0 : i32
    %c0_i32_0 = arith.constant 0 : i32
    return %c0_i32, %arg0 : i32, i32
  }
}

</mosaic_0001>

<bundles_post_ra>
// kernel: tpu_custom_call.1
= control target key start
LH: loop header
LB: loop body
LE: loop exit
PB: predicated region body
PF: predicated region fallthrough
CT: control target
= control target key end

     0   :  { %vm44_vm0 = vcmask 64512   ;;  %vm145_vm1 = vcmask 130048   ;;  %v752_v2 = vmov 0   ;;  %vm306_vm2 = vcmask 261120   ;;  %s934_s1 = inlined_call_operand.vmem [shape: f32[8,8], index: 1, kind: input, shape index: {}]   ;;  %s935_s3 = inlined_call_operand.vmem [shape: f32[32,8], index: 3, kind: input, shape index: {}]   ;;  %s936_s0 = inlined_call_operand.vmem [shape: f32[8,16], index: 0, kind: input, shape index: {}]   ;;  %s937_s4 = inlined_call_operand.vmem [shape: f32[32,1], index: 4, kind: input, shape index: {}]   ;;  %s938_s2 = inlined_call_operand.vmem [shape: f32[32,16], index: 2, kind: input, shape index: {}]   ;;  %s939_s6 = inlined_call_operand.vmem [shape: f32[32,1], index: 6, kind: input, shape index: {}]   ;;  %s940_s8 = inlined_call_operand.vmem [shape: f32[32,1], index: 8, kind: input, shape index: {}]   ;;  %s941_s5 = inlined_call_operand.vmem [shape: f32[32,32], index: 5, kind: input, shape index: {}]   ;;  %s942_s7 = inlined_call_operand.vmem [shape: f32[32,32], index: 7, kind: input, shape index: {}]   ;;  %s943_s9 = inlined_call_operand.vmem [shape: f32[16,8], index: 9, kind: output, shape index: {0}]   ;;  %s944_s10 = inlined_call_operand.vmem [shape: f32[16,8], index: 10, kind: output, shape index: {1}]  }
   0x1   :  { %v43_v0 = vld [vmem:[%s934_s1] sm:$0xff]  ;;  %730 = vset.pattern.permute.xlu0 %v752_v2  ;;  %731 = vset.pattern.permute.xlu1 %v752_v2  ;;  %v40_v4 = vld [vmem:[%s935_s3 + $0x8] sm:$0xff]  ;;  %v41_v5 = vld [vmem:[%s935_s3 + $0x10] sm:$0xff] }
   0x2   :  { %v39_v1 = vld [vmem:[%s935_s3] sm:$0xff]  ;;  %665 = vmatprep.subr.msk.mxu0 %vm44_vm0, %v43_v0  ;;  %v248_v7 = vld [vmem:[%s937_s4 + $0x10] sm:$0xff]  ;;  %v247_v8 = vld [vmem:[%s937_s4 + $0x8] sm:$0xff] }
   0x3   :  { %667 = vmatprep.mubr.msk.f32.mxu0 %vm44_vm0, %v39_v1  ;;  %v38_v3 = vld [vmem:[%s936_s0] sm:$0xff]  ;;  %666 = vmatpush3.xpose.msk.msra.mxu0 %vm44_vm0, %v43_v0  ;;  %v249_v9 = vld [vmem:[%s937_s4 + $0x18] sm:$0xff]  ;;  %v283_v13 = vld [vmem:[%s939_s6 + $0x8] sm:$0xff] }
   0x4   :  { %673 = vmatprep.subr.msk.mxu0 %vm145_vm1, %v38_v3  ;;  %v246_v6 = vld [vmem:[%s937_s4] sm:$0xff]  ;;  %262 = vperm.xlu1 %731, %v248_v7   ;;  %v42_v10 = vld [vmem:[%s935_s3 + $0x18] sm:$0xff]  ;;  %v35_v14 = vld [vmem:[%s938_s2 + $0x8] sm:$0xff] }
   0x5   :  { %252 = vperm.xlu0 %730, %v246_v6   ;;  %v34_v11 = vld [vmem:[%s938_s2] sm:$0xff]  ;;  %v36_v15 = vld [vmem:[%s938_s2 + $0x10] sm:$0xff]  ;;  %v285_v17 = vld [vmem:[%s939_s6 + $0x18] sm:$0xff] }
   0x6   :  { %668 = vmatmul.mubr.msk.f32.vlgmr.msra.gmra.mrb[0].mxu0 %vm44_vm0, %v40_v4  ;;  %v282_v12 = vld [vmem:[%s939_s6] sm:$0xff]  ;;  %v284_v16 = vld [vmem:[%s939_s6 + $0x10] sm:$0xff]  ;;  %v37_v18 = vld [vmem:[%s938_s2 + $0x18] sm:$0xff] }
   0x7   :  { %674 = vmatpush3.xpose.msk.msra.mxu0 %vm145_vm1, %v38_v3  ;;  %670 = vmatprep.mubr.msk.f32.mxu0 %vm44_vm0, %v41_v5  ;;  %v414_v19 = vld [vmem:[%s940_s8 + $0x10] sm:$0xff]  ;;  %v415_v20 = vld [vmem:[%s940_s8 + $0x18] sm:$0xff]  ;;  %v412_v21 = vld [vmem:[%s940_s8] sm:$0xff] }
   0x8   :  { %267 = vperm.xlu1 %731, %v249_v9   ;;  %v413_v22 = vld [vmem:[%s940_s8 + $0x8] sm:$0xff]  ;;  %v278_v23 = vld [vmem:[%s941_s5] sm:$0xff]  ;;  %v280_v43 = vld [vmem:[%s941_s5 + $0x10] sm:$0xff] }
   0x9   :  { %257 = vperm.xlu0 %730, %v247_v8   ;;  %689 = vmatprep.mubr.msk.f32.mxu1 %vm306_vm2, %v278_v23  ;;  %v279_v42 = vld [vmem:[%s941_s5 + $0x8] sm:$0xff]  ;;  %v281_v44 = vld [vmem:[%s941_s5 + $0x18] sm:$0xff]  ;;  %v408_v45 = vld [vmem:[%s942_s7] sm:$0xff] }
   0xa   :  { %671 = vmatmul.mubr.msk.f32.gmra.mrb[2].mxu0 %vm44_vm0, %v42_v10  ;;  %v409_v0 = vld [vmem:[%s942_s7 + $0x8] sm:$0xff]  ;;  %v410_v1 = vld [vmem:[%s942_s7 + $0x10] sm:$0xff]  ;;  %v411_v2 = vld [vmem:[%s942_s7 + $0x18] sm:$0xff] }
   0xb   :  { %675 = vmatprep.mubr.msk.f32.mxu0 %vm145_vm1, %v34_v11 }
   0xc   :  { %293 = vperm.xlu1 %731, %v283_v13  }
   0xd   :  { %288 = vperm.xlu0 %730, %v282_v12  }
   0xe   :  { %676 = vmatmul.mubr.msk.f32.vlgmr.msra.gmra.mrb[0].mxu0 %vm145_vm1, %v35_v14 }
   0xf   :  { %678 = vmatprep.mubr.msk.f32.mxu0 %vm145_vm1, %v36_v15 }
  0x10   :  { %303 = vperm.xlu1 %731, %v285_v17  }
  0x11   :  { %298 = vperm.xlu0 %730, %v284_v16  }
  0x12   :  { %679 = vmatmul.mubr.msk.f32.gmra.mrb[2].mxu0 %vm145_vm1, %v37_v18 }
  0x14   :  { %433 = vperm.xlu1 %731, %v415_v20  }
  0x15   :  { %428 = vperm.xlu0 %730, %v414_v19  }
  0x18   :  { %423 = vperm.xlu1 %731, %v413_v22  }
  0x19   :  { %418 = vperm.xlu0 %730, %v412_v21  }
  0x83   :  { %v263_v25 = vpop.permute.xlu1 %262 }
  0x84   :  { %v253_v24 = vpop.permute.xlu0 %252 }
  0x87   :  { %v268_v32 = vpop.permute.xlu1 %267 }
  0x88   :  { %v258_v26 = vpop.permute.xlu0 %257 }
  0x8b   :  { %v294_v46 = vpop.permute.xlu1 %293 }
  0x8c   :  { %v289_v47 = vpop.permute.xlu0 %288 }
  0x8f   :  { %v304_v53 = vpop.permute.xlu1 %303 }
  0x90   :  { %v299_v56 = vpop.permute.xlu0 %298 }
  0x93   :  { %v434_v3 = vpop.permute.xlu1 %433 }
  0x94   :  { %v429_v4 = vpop.permute.xlu0 %428 }
  0x97   :  { %v424_v5 = vpop.permute.xlu1 %423 }
  0x98   :  { %v419_v7 = vpop.permute.xlu0 %418 }
  0xe1   :  { %v677_v27 = vpop.f32.mrb[0].mxu0 }
  0xe2   :  { %v271_v28 = vadd.f32 %v677_v27, %v258_v26  ;;  %v227_v29 = vpop.f32.mrb[1].mxu0 }
  0xe3   :  { %v270_v30 = vadd.f32 %v253_v24, %v227_v29 }
  0xe4   :  { %v275_v31 = vmax.f32 %v271_v28, 0.0 }
  0xe5   :  { %v274_v33 = vmax.f32 %v270_v30, 0.0  ;;  %v680_v34 = vpop.f32.mrb[2].mxu0 }
  0xe6   :  { %v273_v35 = vadd.f32 %v680_v34, %v268_v32  ;;  %v237_v36 = vpop.f32.mrb[3].mxu0 }
  0xe7   :  { %v272_v37 = vadd.f32 %v263_v25, %v237_v36  ;;  %v709_v38 = vpack.c.bf16 %v275_v31, %v274_v33 }
  0xe8   :  { %v277_v39 = vmax.f32 %v273_v35, 0.0 }
  0xe9   :  { %v276_v40 = vmax.f32 %v272_v37, 0.0  ;;  %710 = vmatprep.subr.bf16.mxu1 %v709_v38 }
  0xea   :  { %712 = vmatpush3.bf16.msra.mxu1 %v709_v38 }
  0xeb   :  { %v713_v41 = vpack.c.bf16 %v277_v39, %v276_v40 }
  0xed   :  { %714 = vmatprep.subr.bf16.mxu1 %v713_v41 }
  0xee   :  { %716 = vmatpush3.bf16.msra.mxu1 %v713_v41 }
  0xf1   :  { %690 = vmatmul.mubr.msk.f32.vlgmr.msra.gmra.mrb[0].mxu1 %vm306_vm2, %v279_v42 }
  0xf2   :  { %692 = vmatprep.mubr.msk.f32.mxu1 %vm306_vm2, %v280_v43 }
  0xf5   :  { %693 = vmatmul.mubr.msk.f32.gmra.mrb[2].mxu1 %vm306_vm2, %v281_v44 }
  0xf6   :  { %703 = vmatprep.mubr.msk.f32.mxu1 %vm306_vm2, %v408_v45 }
 0x1c4   :  { %v691_v48 = vpop.f32.mrb[0].mxu1 }
 0x1c5   :  { %v391_v49 = vadd.f32 %v691_v48, %v294_v46  ;;  %v385_v50 = vpop.f32.mrb[1].mxu1 }
 0x1c6   :  { %v386_v51 = vadd.f32 %v385_v50, %v289_v47 }
 0x1c7   :  { %v405_v52 = vmax.f32 %v391_v49, 0.0 }
 0x1c8   :  { %v404_v54 = vmax.f32 %v386_v51, 0.0  ;;  %v694_v55 = vpop.f32.mrb[2].mxu1 }
 0x1c9   :  { %v401_v57 = vadd.f32 %v694_v55, %v304_v53  ;;  %v395_v58 = vpop.f32.mrb[3].mxu1 }
 0x1ca   :  { %v717_v59 = vpack.c.bf16 %v405_v52, %v404_v54  ;;  %v396_v60 = vadd.f32 %v395_v58, %v299_v56 }
 0x1cb   :  { %v407_v61 = vmax.f32 %v401_v57, 0.0 }
 0x1cc   :  { %v406_v62 = vmax.f32 %v396_v60, 0.0  ;;  %718 = vmatprep.subr.bf16.mxu1 %v717_v59 }
 0x1cd   :  { %720 = vmatpush3.bf16.msra.mxu1 %v717_v59 }
 0x1ce   :  { %v721_v63 = vpack.c.bf16 %v407_v61, %v406_v62 }
 0x1d0   :  { %722 = vmatprep.subr.bf16.mxu1 %v721_v63 }
 0x1d1   :  { %724 = vmatpush3.bf16.msra.mxu1 %v721_v63 }
 0x1d4   :  { %704 = vmatmul.mubr.msk.f32.vlgmr.msra.gmra.mrb[4].mxu1 %vm306_vm2, %v409_v0 }
 0x1d5   :  { %706 = vmatprep.mubr.msk.f32.mxu1 %vm306_vm2, %v410_v1 }
 0x1d8   :  { %707 = vmatmul.mubr.msk.f32.gmra.mrb[6].mxu1 %vm306_vm2, %v411_v2 }
 0x2a7   :  { %v705_v6 = vpop.f32.mrb[4].mxu1 }
 0x2a8   :  { %v520_v8 = vadd.f32 %v705_v6, %v424_v5  ;;  %v514_v9 = vpop.f32.mrb[5].mxu1 }
 0x2a9   :  { %v515_v10 = vadd.f32 %v514_v9, %v419_v7 }
 0x2aa   :  { %v534_v11 = vmul.f32 0.033333335, %v520_v8 }
 0x2ab   :  { %v533_v12 = vmul.f32 0.033333335, %v515_v10  ;;  %v708_v13 = vpop.f32.mrb[6].mxu1 }
 0x2ac   :  { %732 = vtanh.f32 %v534_v11  ;;  %v530_v14 = vadd.f32 %v708_v13, %v434_v3  ;;  %v524_v15 = vpop.f32.mrb[7].mxu1 }
 0x2ad   :  { %734 = vtanh.f32 %v533_v12  ;;  %v525_v16 = vadd.f32 %v524_v15, %v429_v4 }
 0x2ae   :  { %v540_v17 = vsub.f32 10.0, %v530_v14 }
 0x2af   :  { %v539_v18 = vsub.f32 10.0, %v525_v16 }
 0x2b0   :  { %v544_v19 = vand.u32 2147483647, %v540_v17  ;;  %v542_v43 = vmax.f32 %v540_v17, 0.0 }
 0x2b1   :  { %v543_v20 = vand.u32 2147483647, %v539_v18  ;;  %v541_v47 = vmax.f32 %v539_v18, 0.0 }
 0x2b2   :  { %v546_v21 = vsub.f32 0.0, %v544_v19 }
 0x2b3   :  { %v545_v22 = vsub.f32 0.0, %v543_v20 }
 0x2b4   :  { %v549_v23 = vmul.f32 1.442695, %v546_v21 }
 0x2b5   :  { %v547_v24 = vmul.f32 1.442695, %v545_v22 }
 0x2b6   :  { %v733_v25 = vpop.eup %732  ;;  %736 = vpow2.f32 %v549_v23 }
 0x2b7   :  { %v735_v26 = vpop.eup %734  ;;  %v538_v27 = vmul.f32 30.0, %v733_v25  ;;  %738 = vpow2.f32 %v547_v24 }
 0x2b8   :  { %v537_v28 = vmul.f32 30.0, %v735_v26 }
 0x2b9   :  { %608 = vst.msk [vmem:[%s943_s9 + $0x8] sm:$0xff] %vm44_vm0, %v538_v27 }
 0x2ba   :  { %607 = vst.msk [vmem:[%s943_s9] sm:$0xff] %vm44_vm0, %v537_v28 }
 0x2c0   :  { %v737_v29 = vpop.eup %736 }
 0x2c1   :  { %v739_v30 = vpop.eup %738  ;;  %v560_v31 = vadd.f32 1.0, %v737_v29  ;;  %v563_v33 = vmul.f32 -0.5, %v737_v29  ;;  %v566_v36 = vand.u32 2147483647, %v737_v29 }
 0x2c2   :  { %v551_v32 = vadd.f32 1.0, %v739_v30  ;;  %v554_v34 = vmul.f32 -0.5, %v739_v30  ;;  %v557_v38 = vand.u32 2147483647, %v739_v30 }
 0x2c3   :  { %740 = vlog2.f32 %v560_v31  ;;  %v564_v35 = vadd.f32 1.0, %v563_v33  ;;  %vm567_vm3 = vcmp.lt.f32.partialorder %v566_v36, 0.0004427343 }
 0x2c4   :  { %742 = vlog2.f32 %v551_v32  ;;  %v555_v37 = vadd.f32 1.0, %v554_v34  ;;  %vm558_vm4 = vcmp.lt.f32.partialorder %v557_v38, 0.0004427343 }
 0x2c5   :  { %v565_v42 = vmul.f32 %v737_v29, %v564_v35 }
 0x2c6   :  { %v556_v45 = vmul.f32 %v739_v30, %v555_v37 }
 0x2cd   :  { %v741_v39 = vpop.eup %740 }
 0x2ce   :  { %v743_v40 = vpop.eup %742  ;;  %v562_v41 = vmul.f32 0.6931472, %v741_v39 }
 0x2cf   :  { %v553_v44 = vmul.f32 0.6931472, %v743_v40 }
 0x2d0   :  { %v568_v46 = vsel %vm567_vm3, %v565_v42, %v562_v41 }
 0x2d1   :  { %v570_v48 = vadd.f32 %v568_v46, %v542_v43  ;;  %v559_v49 = vsel %vm558_vm4, %v556_v45, %v553_v44 }
 0x2d2   :  { %v569_v50 = vadd.f32 %v559_v49, %v541_v47 }
 0x2d3   :  { %v572_v51 = vsub.f32 10.0, %v570_v48 }
 0x2d4   :  { %v571_v52 = vsub.f32 10.0, %v569_v50 }
 0x2d5   :  { %v638_v53 = vadd.f32 -0.1, %v572_v51 }
 0x2d6   :  { %v637_v54 = vadd.f32 -0.1, %v571_v52 }
 0x2d7   :  { %v578_v55 = vand.u32 2147483647, %v638_v53  ;;  %v576_v11 = vmax.f32 %v638_v53, 0.0 }
 0x2d8   :  { %v577_v56 = vand.u32 2147483647, %v637_v54  ;;  %v575_v15 = vmax.f32 %v637_v54, 0.0 }
 0x2d9   :  { %v580_v57 = vsub.f32 0.0, %v578_v55 }
 0x2da   :  { %v579_v58 = vsub.f32 0.0, %v577_v56 }
 0x2db   :  { %v583_v59 = vmul.f32 1.442695, %v580_v57 }
 0x2dc   :  { %v581_v60 = vmul.f32 1.442695, %v579_v58 }
 0x2dd   :  { %744 = vpow2.f32 %v583_v59 }
 0x2de   :  { %746 = vpow2.f32 %v581_v60 }
 0x2e7   :  { %v745_v61 = vpop.eup %744 }
 0x2e8   :  { %v747_v62 = vpop.eup %746  ;;  %v594_v63 = vadd.f32 1.0, %v745_v61  ;;  %v597_v1 = vmul.f32 -0.5, %v745_v61  ;;  %v600_v4 = vand.u32 2147483647, %v745_v61 }
 0x2e9   :  { %v585_v0 = vadd.f32 1.0, %v747_v62  ;;  %v588_v2 = vmul.f32 -0.5, %v747_v62  ;;  %v591_v6 = vand.u32 2147483647, %v747_v62 }
 0x2ea   :  { %748 = vlog2.f32 %v594_v63  ;;  %v598_v3 = vadd.f32 1.0, %v597_v1  ;;  %vm601_vm5 = vcmp.lt.f32.partialorder %v600_v4, 0.0004427343 }
 0x2eb   :  { %750 = vlog2.f32 %v585_v0  ;;  %v589_v5 = vadd.f32 1.0, %v588_v2  ;;  %vm592_vm6 = vcmp.lt.f32.partialorder %v591_v6, 0.0004427343 }
 0x2ec   :  { %v599_v10 = vmul.f32 %v745_v61, %v598_v3 }
 0x2ed   :  { %v590_v13 = vmul.f32 %v747_v62, %v589_v5 }
 0x2f4   :  { %v749_v7 = vpop.eup %748 }
 0x2f5   :  { %v751_v8 = vpop.eup %750  ;;  %v596_v9 = vmul.f32 0.6931472, %v749_v7 }
 0x2f6   :  { %v587_v12 = vmul.f32 0.6931472, %v751_v8 }
 0x2f7   :  { %v602_v14 = vsel %vm601_vm5, %v599_v10, %v596_v9 }
 0x2f8   :  { %v604_v16 = vadd.f32 %v602_v14, %v576_v11  ;;  %v593_v17 = vsel %vm592_vm6, %v590_v13, %v587_v12 }
 0x2f9   :  { %v603_v18 = vadd.f32 %v593_v17, %v575_v15 }
 0x2fa   :  { %v606_v19 = vadd.f32 0.1, %v604_v16 }
 0x2fb   :  { %v605_v20 = vadd.f32 0.1, %v603_v18 }
 0x2fc   :  { %610 = vst.msk [vmem:[%s944_s10 + $0x8] sm:$0xff] %vm44_vm0, %v606_v19 }
 0x2fd   :  { %609 = vst.msk [vmem:[%s944_s10] sm:$0xff] %vm44_vm0, %v605_v20 }

</bundles_post_ra>
